<compile_context>
chip_gen: v6e
topology: v6e:2x2x1
jax: 0.10.0
libtpu: 0.0.40
codegen_flags: <defaults>
</compile_context>

<pallas_src>
import jax
import jax.numpy as jnp
from jax.experimental import pallas as pl
from jax.experimental.pallas import tpu as pltpu


def _fused_linear_relu_pwconv_kernel(x_ref, wt_ref, b_ref, ws_ref, o_ref):
    """One batch row per grid step.

    x_ref : (1, L, C) VMEM  -- x1 pre-permuted to (N, L, C) by the wrapper
    wt_ref: (C, O)    VMEM  -- linear weight, transposed
    b_ref : (1, O)    VMEM  -- linear bias as a lane row
    ws_ref: (O, C)    SMEM  -- linear weight (original layout), read as scalars
    o_ref : (1, O, O) VMEM  -- conv output (out_channels, length)
    """
    x = x_ref[0]                      # (L, C)
    L, C = x.shape
    O = o_ref.shape[1]

    # ---- Linear on the (already permuted) input, result in (L, O) layout ----
    # v2[l, o] = sum_c x[l, c] * Wt[c, o] + b[o]
    v2 = b_ref[...]                                        # (1, O), broadcasts over sublanes
    for c in range(C):                                     # unrolled (C == 2)
        v2 = v2 + x[:, c:c + 1] * wt_ref[c:c + 1, :]       # (L, 1) * (1, O) -> (L, O)

    # ---- ReLU ----
    x2 = jnp.maximum(v2, 0.0)                              # (L, O)

    # ---- Pointwise (k=1) conv1d with the same weight ----
    # out[oc, t] = sum_l W[oc, l] * x2[l, t]
    # SMEM scalar weight * sublane row of x2: pure VPU, no rank-3 temp, no lane reduce.
    rows = []
    for oc in range(O):                                    # unrolled (O == 2)
        acc = ws_ref[oc, 0] * x2[0:1, :]                   # (1, O)
        for l in range(1, L):
            acc = acc + ws_ref[oc, l] * x2[l:l + 1, :]
        rows.append(acc)
    out = jnp.concatenate(rows, axis=0)                    # (O, O)

    o_ref[0] = out.astype(o_ref.dtype)


def model_forward(x1, weight, bias):
    """x1: (N, C, L); weight: (O, C); bias: (O,). Returns (N, O, O)."""
    n, c, l = x1.shape
    o, c_w = weight.shape
    assert c_w == c, f"Linear in_features ({c_w}) must match x1 channel dim ({c})"
    # The k=1 conv reuses the (O, C) linear weight as its kernel, so its in_channels
    # (= C) must equal the sequence length L of x1 (review correctness caveat).
    assert c_w == l, (
        f"pointwise-conv reuse of the linear weight requires in_features == L "
        f"(got {c_w} vs {l})")

    # Free wrapper-side layout plumbing (per perf review): fold the permute, weight
    # transpose and bias reshape here so the kernel body only touches sublane rows,
    # lane-column data slices and SMEM scalars.
    x_lc = jnp.transpose(x1, (0, 2, 1))        # (N, L, C)
    w_t = jnp.transpose(weight, (1, 0))        # (C, O)
    b_row = bias.reshape(1, o)                 # (1, O)

    return pl.pallas_call(
        _fused_linear_relu_pwconv_kernel,
        out_shape=jax.ShapeDtypeStruct((n, o, o), x1.dtype),
        grid=(n,),
        in_specs=[
            pl.BlockSpec((1, l, c), lambda i: (i, 0, 0)),              # x (per-batch block)
            pl.BlockSpec((c, o), lambda i: (0, 0)),                    # w_t (whole, VMEM)
            pl.BlockSpec((1, o), lambda i: (0, 0)),                    # bias row (VMEM)
            pl.BlockSpec(memory_space=pltpu.MemorySpace.SMEM),         # weight scalars
        ],
        out_specs=pl.BlockSpec((1, o, o), lambda i: (i, 0, 0)),
        compiler_params=pltpu.CompilerParams(
            dimension_semantics=("parallel",)),
    )(x_lc, w_t, b_row, weight)


if __name__ == "__main__":
    key = jax.random.PRNGKey(0)
    k_x, k_w, k_b = jax.random.split(key, 3)

    # Shapes from the module: x1 = randn(1, 2, 2), Linear(2, 2)
    x1 = jax.random.normal(k_x, (1, 2, 2), dtype=jnp.float32)
    bound = 1.0 / jnp.sqrt(2.0)  # mimic torch Linear init range
    weight = jax.random.uniform(k_w, (2, 2), jnp.float32, -bound, bound)
    bias = jax.random.uniform(k_b, (2,), jnp.float32, -bound, bound)

    out = model_forward(x1, weight, bias)
    jax.block_until_ready(out)

    # Pure-JAX reference of the same semantics.
    v1 = jnp.transpose(x1, (0, 2, 1))                      # (N, L, C)
    v2 = jnp.einsum("nlc,oc->nlo", v1, weight) + bias      # (N, L, O)
    x2 = jnp.maximum(v2, 0.0)
    ref = jnp.einsum("oc,nct->not", weight, x2)            # (N, O, O)

    assert out.shape == (1, 2, 2)
    assert jnp.allclose(out, ref, atol=1e-5, rtol=1e-5)

    print("KERNEL_OK")
</pallas_src>

<mosaic_0001>
module attributes {stable_mosaic.version = 11 : i64} {
  func.func @_fused_linear_relu_pwconv_kernel(%arg0: i32, %arg1: memref<1x2x2xf32, #tpu.memory_space<vmem>>, %arg2: memref<2x2xf32, #tpu.memory_space<vmem>>, %arg3: memref<1x2xf32, #tpu.memory_space<vmem>>, %arg4: memref<2x2xf32, #tpu.memory_space<smem>>, %arg5: memref<1x2x2xf32, #tpu.memory_space<vmem>>) attributes {dimension_semantics = [#tpu.dimension_semantics<parallel>], iteration_bounds = array<i64: 1>, scalar_prefetch = 0 : i64, scratch_operands = 0 : i64, tpu.core_type = #tpu.core_type<tc>, window_params = [{transform_indices = @transform_0, window_bounds = array<i64: 1, 2, 2>}, {pipeline_mode = #tpu.pipeline_mode<synchronous>, transform_indices = @transform_1, window_bounds = array<i64: 2, 2>}, {pipeline_mode = #tpu.pipeline_mode<synchronous>, transform_indices = @transform_2, window_bounds = array<i64: 1, 2>}, {transform_indices = @transform_3, window_bounds = array<i64: 2, 2>}, {transform_indices = @transform_4, window_bounds = array<i64: 1, 2, 2>}]} {
    %c0 = arith.constant 0 : index
    %c0_0 = arith.constant 0 : index
    %c0_1 = arith.constant 0 : index
    %0 = vector.load %arg1[%c0, %c0_0, %c0_1] : memref<1x2x2xf32, #tpu.memory_space<vmem>>, vector<1x2x2xf32>
    %1 = vector.shape_cast %0 : vector<1x2x2xf32> to vector<2x2xf32>
    %c0_2 = arith.constant 0 : index
    %c0_3 = arith.constant 0 : index
    %2 = vector.load %arg3[%c0_2, %c0_3] : memref<1x2xf32, #tpu.memory_space<vmem>>, vector<1x2xf32>
    %3 = vector.extract_strided_slice %1 {offsets = [0, 0], sizes = [2, 1], strides = [1, 1]} : vector<2x2xf32> to vector<2x1xf32>
    %c0_4 = arith.constant 0 : index
    %c0_5 = arith.constant 0 : index
    %4 = vector.load %arg2[%c0_4, %c0_5] : memref<2x2xf32, #tpu.memory_space<vmem>>, vector<1x2xf32>
    %5 = vector.broadcast %3 : vector<2x1xf32> to vector<2x2xf32>
    %6 = vector.broadcast %4 : vector<1x2xf32> to vector<2x2xf32>
    %7 = arith.mulf %5, %6 : vector<2x2xf32>
    %8 = vector.broadcast %2 : vector<1x2xf32> to vector<2x2xf32>
    %9 = arith.addf %8, %7 : vector<2x2xf32>
    %10 = vector.extract_strided_slice %1 {offsets = [0, 1], sizes = [2, 1], strides = [1, 1]} : vector<2x2xf32> to vector<2x1xf32>
    %c1 = arith.constant 1 : index
    %c0_6 = arith.constant 0 : index
    %11 = vector.load %arg2[%c1, %c0_6] : memref<2x2xf32, #tpu.memory_space<vmem>>, vector<1x2xf32>
    %12 = vector.broadcast %10 : vector<2x1xf32> to vector<2x2xf32>
    %13 = vector.broadcast %11 : vector<1x2xf32> to vector<2x2xf32>
    %14 = arith.mulf %12, %13 : vector<2x2xf32>
    %15 = arith.addf %9, %14 : vector<2x2xf32>
    %cst = arith.constant 0.000000e+00 : f32
    %16 = vector.broadcast %cst : f32 to vector<2x2xf32>
    %17 = arith.maximumf %15, %16 : vector<2x2xf32>
    %c0_7 = arith.constant 0 : index
    %c0_8 = arith.constant 0 : index
    %18 = memref.load %arg4[%c0_7, %c0_8] : memref<2x2xf32, #tpu.memory_space<smem>>
    %19 = vector.extract_strided_slice %17 {offsets = [0, 0], sizes = [1, 2], strides = [1, 1]} : vector<2x2xf32> to vector<1x2xf32>
    %20 = vector.broadcast %18 : f32 to vector<1x2xf32>
    %21 = arith.mulf %20, %19 : vector<1x2xf32>
    %c0_9 = arith.constant 0 : index
    %c1_10 = arith.constant 1 : index
    %22 = memref.load %arg4[%c0_9, %c1_10] : memref<2x2xf32, #tpu.memory_space<smem>>
    %23 = vector.extract_strided_slice %17 {offsets = [1, 0], sizes = [1, 2], strides = [1, 1]} : vector<2x2xf32> to vector<1x2xf32>
    %24 = vector.broadcast %22 : f32 to vector<1x2xf32>
    %25 = arith.mulf %24, %23 : vector<1x2xf32>
    %26 = arith.addf %21, %25 : vector<1x2xf32>
    %c1_11 = arith.constant 1 : index
    %c0_12 = arith.constant 0 : index
    %27 = memref.load %arg4[%c1_11, %c0_12] : memref<2x2xf32, #tpu.memory_space<smem>>
    %28 = vector.extract_strided_slice %17 {offsets = [0, 0], sizes = [1, 2], strides = [1, 1]} : vector<2x2xf32> to vector<1x2xf32>
    %29 = vector.broadcast %27 : f32 to vector<1x2xf32>
    %30 = arith.mulf %29, %28 : vector<1x2xf32>
    %c1_13 = arith.constant 1 : index
    %c1_14 = arith.constant 1 : index
    %31 = memref.load %arg4[%c1_13, %c1_14] : memref<2x2xf32, #tpu.memory_space<smem>>
    %32 = vector.extract_strided_slice %17 {offsets = [1, 0], sizes = [1, 2], strides = [1, 1]} : vector<2x2xf32> to vector<1x2xf32>
    %33 = vector.broadcast %31 : f32 to vector<1x2xf32>
    %34 = arith.mulf %33, %32 : vector<1x2xf32>
    %35 = arith.addf %30, %34 : vector<1x2xf32>
    %36 = tpu.concatenate %26, %35 in 0 : vector<1x2xf32>, vector<1x2xf32> -> vector<2x2xf32>
    %c0_15 = arith.constant 0 : index
    %c0_16 = arith.constant 0 : index
    %c0_17 = arith.constant 0 : index
    %37 = vector.load %arg5[%c0_15, %c0_16, %c0_17] : memref<1x2x2xf32, #tpu.memory_space<vmem>>, vector<1x2x2xf32>
    %38 = vector.shape_cast %37 : vector<1x2x2xf32> to vector<2x2xf32>
    %39 = vector.shape_cast %36 : vector<2x2xf32> to vector<1x2x2xf32>
    tpu.vector_store %arg5[%c0_15, %c0_16, %c0_17], %39 {strides = array<i32>} : memref<1x2x2xf32, #tpu.memory_space<vmem>>, vector<1x2x2xf32>,
    return
  }
  func.func @transform_0(%arg0: i32) -> (i32, i32, i32) {
    %c0_i32 = arith.constant 0 : i32
    %c0_i32_0 = arith.constant 0 : i32
    %c0_i32_1 = arith.constant 0 : i32
    return %arg0, %c0_i32, %c0_i32_0 : i32, i32, i32
  }
  func.func @transform_1(%arg0: i32) -> (i32, i32) {
    %c0_i32 = arith.constant 0 : i32
    %c0_i32_0 = arith.constant 0 : i32
    %c0_i32_1 = arith.constant 0 : i32
    return %c0_i32, %c0_i32_0 : i32, i32
  }
  func.func @transform_2(%arg0: i32) -> (i32, i32) {
    %c0_i32 = arith.constant 0 : i32
    %c0_i32_0 = arith.constant 0 : i32
    %c0_i32_1 = arith.constant 0 : i32
    return %c0_i32, %c0_i32_0 : i32, i32
  }
  func.func @transform_3(%arg0: i32) -> (i32, i32) {
    %c0_i32 = arith.constant 0 : i32
    %c0_i32_0 = arith.constant 0 : i32
    %c0_i32_1 = arith.constant 0 : i32
    return %c0_i32, %c0_i32_0 : i32, i32
  }
  func.func @transform_4(%arg0: i32) -> (i32, i32, i32) {
    %c0_i32 = arith.constant 0 : i32
    %c0_i32_0 = arith.constant 0 : i32
    %c0_i32_1 = arith.constant 0 : i32
    return %arg0, %c0_i32, %c0_i32_0 : i32, i32, i32
  }
}

</mosaic_0001>

<bundles_post_ra>
// kernel: tpu_custom_call.1
= control target key start
LH: loop header
LB: loop body
LE: loop exit
PB: predicated region body
PF: predicated region fallthrough
CT: control target
= control target key end

     0   :  { %9 = vsyncpa [#allocation3], 0  ;;  %s271_s0 = inlined_call_operand.hbm [shape: f32[1,2,2], index: 0, kind: input, shape index: {}]   ;;  %s272_s1 = inlined_call_operand.hbm [shape: f32[2,2], index: 1, kind: input, shape index: {}]   ;;  %s273_s2 = inlined_call_operand.vmem [shape: f32[1,2], index: 2, kind: input, shape index: {}]   ;;  %s274_s3 = inlined_call_operand.vmem [shape: f32[2,2], index: 3, kind: input, shape index: {}]   ;;  %s275_s4 = inlined_call_operand.hbm [shape: f32[1,2,2], index: 4, kind: output, shape index: {}]  }
   0x1   :  { %10 = vsyncpa [#allocation7], 0 }
   0x2   :  { %11 = vsyncpa [#allocation5], 0 }
   0x3   :  { %12 = vsyncpa [#allocation4], 0  ;;  %s225_s15 = smov [#allocation2]   ;;  %s226_s17 = smov [#allocation6]  }
   0x4   :  { %s19_s16 = sshll.u32 %s225_s15, 4  ;;  %s29_s18 = sshll.u32 %s226_s17, 4  ;;  %s20_s16 = int_to_ptr.vmem [resolvable:$true] %s19_s16  ;;  %s30_s18 = int_to_ptr.vmem [resolvable:$true] %s29_s18 }
   0x5   :  { %s153_s19 = scalar_lea.vmem %s20_s16, 32  ;;  %p158_p1 = scmp.lt.s32.totalorder %s20_s16, %s20_s16 }
   0x6   :  { %p154_p0 = scmp.ne.s32.totalorder %s20_s16, %s153_s19  ;;  %p159_p2 = scmp.lt.s32.totalorder %s153_s19, %s153_s19 }
   0x8   :  { %p160_p3 = por %p159_p2, %p158_p1 }
   0xa   :  { %p161_p4 = pnand %p160_p3, %p154_p0 }
   0xc   :  { %164 = shalt.err (!%p161_p4)
}
   0xd   :  { %22 = dma.hbm_to_vmem [thread:$0]  %s271_s0, 32, %s20_s16, [#allocation3]  }
   0xe   :  { %s173_s22 = scalar_lea.vmem %s30_s18, 32  ;;  %p178_p6 = scmp.lt.s32.totalorder %s30_s18, %s30_s18 }
   0xf   :  { %p174_p5 = scmp.ne.s32.totalorder %s30_s18, %s173_s22  ;;  %p179_p7 = scmp.lt.s32.totalorder %s173_s22, %s173_s22 }
  0x11   :  { %p180_p8 = por %p179_p7, %p178_p6 }
  0x13   :  { %p181_p9 = pnand %p180_p8, %p174_p5 }
  0x15   :  { %184 = shalt.err (!%p181_p9)
}
  0x16   :  { %32 = dma.hbm_to_vmem [thread:$0]  %s272_s1, 32, %s30_s18, [#allocation7]  }
  0x17   :  { %s41_s27 = sshll.u32 %s274_s3, 4  ;;  %s42_s27 = int_to_ptr.vmem [resolvable:$true] %s41_s27 }
  0x18   :  { %s185_s28 = scalar_lea.vmem %s42_s27, 32  ;;  %p190_p11 = scmp.lt.s32.totalorder %s42_s27, %s42_s27 }
  0x19   :  { %p186_p10 = scmp.ne.s32.totalorder %s42_s27, %s185_s28  ;;  %p191_p12 = scmp.lt.s32.totalorder %s185_s28, %s185_s28 }
  0x1b   :  { %p192_p13 = por %p191_p12, %p190_p11 }
  0x1d   :  { %p193_p0 = pnand %p192_p13, %p186_p10 }
  0x1f   :  { %196 = shalt.err (!%p193_p0)
}
  0x20   :  { %s227_s0 = smov [#allocation8]  }
  0x21   :  { %44 = dma.vmem_to_smem %s42_s27, 32, %s227_s0, [#allocation5]  }
  0x22   :  { %217 = dma.done.wait [#allocation3], 32  }
  0x23   :  { %218 = vsyncadd [#allocation3], 4294967264 }
  0x24   :  { %219 = dma.done.wait [#allocation7], 32  }
  0x25   :  { %220 = vsyncadd [#allocation7], 4294967264 }
  0x26   :  { %221 = dma.done.wait [#allocation5], 32  }
  0x27   :  { %222 = vsyncadd [#allocation5], 4294967264 }
  0x28   :  { %54 = sfence }
  0x29   :  { %v55_v0 = vld [vmem:[#allocation2] sm:$0x3]  ;;  %v228_v1 = vmov 0   ;;  %v229_v2 = vmov 1   ;;  %v131_v3 = vld [vmem:[#allocation6] ss:$0 sm:$0xff] }
  0x2a   :  { %143 = vset.pattern.permute.xlu0 %v228_v1  ;;  %s134_s1 = sld [smem:[#allocation8 + $0x1]]  ;;  %v132_v6 = vld [vmem:[%s273_s2] ss:$0 sm:$0xff]  ;;  %v133_v7 = vld [vmem:[#allocation6 + $0x1] ss:$0 sm:$0xff]  ;;  %s230_s2 = smov [#allocation9]  }
  0x2b   :  { %60 = vperm.xlu0 %143, %v55_v0   ;;  %s136_s3 = sld [smem:[#allocation8 + $0x81]]  ;;  %s120_s7 = sshll.u32 %s230_s2, 4  ;;  %vm110_vm0 = vcmask 1040384   ;;  %vm112_vm1 = vcmask 9216   ;;  %s121_s7 = int_to_ptr.vmem [resolvable:$true] %s120_s7 }
  0x2c   :  { %s135_s5 = sld [smem:[#allocation8 + $0x80]]  ;;  %s197_s8 = scalar_lea.vmem %s121_s7, 32 }
  0x2d   :  { %s87_s6 = sld [smem:[#allocation8]]  ;;  %p198_p1 = scmp.ne.s32.totalorder %s121_s7, %s197_s8 }
  0x2e   :  { %p202_p2 = scmp.lt.s32.totalorder %s121_s7, %s121_s7  ;;  %p203_p3 = scmp.lt.s32.totalorder %s197_s8, %s197_s8 }
  0x2f   :  { %144 = vset.pattern.permute.xlu0 %v229_v2 }
  0x30   :  { %77 = vperm.xlu0 %144, %v55_v0   ;;  %v91_v12 = vstv %s134_s1  ;;  %p204_p4 = por %p203_p3, %p202_p2 }
  0x31   :  { %v101_v13 = vstv %s136_s3 }
  0x32   :  { %v98_v15 = vstv %s135_s5  ;;  %p205_p5 = pnand %p204_p4, %p198_p1 }
  0x33   :  { %v88_v18 = vstv %s87_s6 }
  0xa6   :  { %v61_v4 = vpop.permute.xlu0 %60 }
  0xa7   :  { %v67_v5 = vmul.f32 %v131_v3, %v61_v4 }
  0xa9   :  { %v74_v9 = vadd.f32 %v132_v6, %v67_v5 }
  0xab   :  { %v78_v8 = vpop.permute.xlu0 %77 }
  0xac   :  { %v84_v10 = vmul.f32 %v133_v7, %v78_v8 }
  0xae   :  { %v85_v11 = vadd.f32 %v84_v10, %v74_v9 }
  0xb0   :  { %v86_v14 = vmax.f32 %v85_v11, 0.0 }
  0xb2   :  { %v92_v16 = vmul.f32 %v91_v12, %v86_v14  ;;  %v102_v17 = vmul.f32 %v101_v13, %v86_v14  ;;  %v99_v20 = vmul.f32 %v98_v15, %v86_v14  ;;  %v89_v22 = vmul.f32 %v88_v18, %v86_v14 }
  0xb4   :  { %v94_v19 = vrot.slane %v92_v16, 1  ;;  %v104_v21 = vrot.slane %v102_v17, 1 }
  0xb6   :  { %v106_v23 = vadd.f32 %v104_v21, %v99_v20  ;;  %v96_v24 = vadd.f32 %v94_v19, %v89_v22 }
  0xb8   :  { %v108_v25 = vrot.slane %v106_v23, 7 }
  0xba   :  { %v111_v26 = vsel %vm110_vm0, %v96_v24, %v108_v25 }
  0xbb   :  { %113 = vst.msk [vmem:[#allocation9] sm:$0x3] %vm112_vm1, %v111_v26 }
  0xbc   :  { %208 = shalt.err (!%p205_p5)
}
  0xbd   :  { %123 = dma.vmem_to_hbm [thread:$0]  %s121_s7, 32, %s275_s4, [#allocation4]  }
  0xbe   :  { %223 = dma.done.wait [#allocation4], 32  }
  0xbf   :  { %224 = vsyncadd [#allocation4], 4294967264 }
  0xc0   :  { %127 = vsyncpa [#allocation3], 1 }
  0xc1   :  { %128 = vsyncpa [#allocation7], 1 }
  0xc2   :  { %129 = vsyncpa [#allocation4], 1 }
  0xc3   :  { %130 = vsyncpa [#allocation5], 1 }

</bundles_post_ra>
